<compile_context>
chip_gen: v7x
topology: tpu7x:2x2x1
jax: 0.10.0
libtpu: 0.0.40
codegen_flags: <defaults>
</compile_context>

<pallas_src>
import functools

import jax
import jax.numpy as jnp
from jax import lax
from jax.experimental import pallas as pl
from jax.experimental.pallas import tpu as pltpu

KH = KW = 7
STRIDE = 4
PAD = 2


def _round_up(x, m):
    return (x + m - 1) // m * m


def _pick_tile_oh(ho, wo_up, max_rows):
    """Largest row-band height that divides Ho and keeps the output block legal."""
    if ho * wo_up <= max_rows:
        return ho                                   # whole image per grid step
    cands = [d for d in range(1, ho)
             if ho % d == 0 and d * wo_up <= max_rows and (d * wo_up) % 128 == 0]
    return max(cands) if cands else ho


def _stem_conv_kernel(x_ref, w_ref, b_ref, o_ref, *, tile_oh, wo_up):
    """One (image, row-band) grid step of the stem conv.

    x_ref: (Hq, Wq, 16*C_in)      space-to-depth'd image (VMEM resident)
    w_ref: (4, 16*C_in, C_out)    polyphase weight matrices (resident)
    b_ref: (1, C_out)             f32 bias (resident)
    o_ref: (C_out, tile_oh*wo_up) NCHW-flat output tile (lane-dense rows)
    """
    kc = x_ref.shape[-1]
    m_t = tile_oh * wo_up
    row0 = pl.program_id(1) * tile_oh

    acc = None
    # 7x7 stride-4 conv == 2x2 stride-1 conv over the 16 stride phases.
    for ah in (0, 1):
        for aw in (0, 1):
            slab = x_ref[pl.ds(row0 + ah, tile_oh), pl.ds(aw, wo_up), :]
            slab = slab.reshape(m_t, kc)            # wo_up % 8 == 0 -> trivial
            part = jnp.dot(slab, w_ref[2 * ah + aw],
                           preferred_element_type=jnp.float32)
            acc = part if acc is None else acc + part
    res = acc + b_ref[...]                          # (m_t, C_out) + (1, C_out)
    # Transpose in-VMEM so the HBM output is already NCHW-ordered and the
    # store's lane dim (m_t) is wide & dense regardless of C_out.
    o_ref[...] = jnp.transpose(res).astype(o_ref.dtype)


def stem_forward(x, weight, bias, *, compute_dtype=jnp.bfloat16,
                 out_dtype=None, tile_oh=None, max_tile_rows=4096):
    """Stem.forward: y = Conv2d(C_in, C_out, k=7, s=4, p=2)(x); norm = Identity.

    x:       (N, C_in, H, W)
    weight:  (C_out, C_in, 7, 7)  (PyTorch OIHW layout)
    bias:    (C_out,)
    compute_dtype: dtype of the streamed operands (accumulation stays f32).
    out_dtype:     kernel output dtype (None -> x.dtype; pass bf16 to halve
                   writeback bytes for bf16 consumers).
    tile_oh: output rows per grid step (must divide Ho; None -> auto).
    returns (N, C_out, H_out, W_out).
    """
    N, C_in, H, W = x.shape
    C_out = weight.shape[0]
    if out_dtype is None:
        out_dtype = x.dtype

    Ho = (H + 2 * PAD - KH) // STRIDE + 1
    Wo = (W + 2 * PAD - KW) // STRIDE + 1
    Wo_up = _round_up(Wo, 8)            # sublane-aligned row-tile width
    Hq, Wq = Ho + 1, Wo_up + 1          # space-to-depth spatial extents
    KC = STRIDE * STRIDE * C_in         # 16*C_in polyphase channels

    # ---- glue: zero-pad + stride-4 space-to-depth (single fused XLA pass,
    #      no size inflation).  xs[n, hq, wq, (bh*4+bw)*C_in + c]
    #                             = x_padded[n, c, 4*hq + bh, 4*wq + bw]
    xp = jnp.pad(x, ((0, 0), (0, 0),
                     (PAD, STRIDE * Hq - H - PAD),
                     (PAD, STRIDE * Wq - W - PAD)))
    xs = xp.reshape(N, C_in, Hq, STRIDE, Wq, STRIDE)
    xs = xs.transpose(0, 2, 4, 3, 5, 1).reshape(N, Hq, Wq, KC)
    xs = xs.astype(compute_dtype)

    # ---- weights: taps with kh==7 / kw==7 are zero-padded so the 7x7 kernel
    #      becomes an exact 2x2 kernel over the 16 phases.
    #      w_all[ah*2+aw, (bh*4+bw)*C_in + c, co] = weight[co, c, 4*ah+bh, 4*aw+bw]
    w8 = jnp.pad(weight, ((0, 0), (0, 0),
                          (0, 2 * STRIDE - KH), (0, 2 * STRIDE - KW)))
    w_all = w8.reshape(C_out, C_in, 2, STRIDE, 2, STRIDE)
    w_all = w_all.transpose(2, 4, 3, 5, 1, 0).reshape(4, KC, C_out)
    w_all = w_all.astype(compute_dtype)
    b2d = bias.reshape(1, C_out).astype(jnp.float32)

    # ---- row-band tiling ----
    if tile_oh is None:
        tile_oh = _pick_tile_oh(Ho, Wo_up, max_tile_rows)
    if Ho % tile_oh != 0 or not (tile_oh == Ho or (tile_oh * Wo_up) % 128 == 0):
        raise ValueError(f"tile_oh={tile_oh} must divide Ho={Ho} and give a "
                         f"128-aligned (or full) output block")
    n_t = Ho // tile_oh
    M_t = tile_oh * Wo_up
    grid = (N, n_t)

    comp_b = jnp.dtype(compute_dtype).itemsize
    out_b = jnp.dtype(out_dtype).itemsize

    cost = pl.CostEstimate(
        flops=2 * N * Ho * Wo_up * (4 * KC) * C_out,
        transcendentals=0,
        bytes_accessed=(xs.size * comp_b + w_all.size * comp_b + C_out * 4
                        + N * C_out * Ho * Wo_up * out_b))

    # VMEM budget from the actual block sizes (double-buffered) + in-kernel
    # intermediates, with headroom; capped below a v7x core's 64 MiB.
    xs_blk = Hq * _round_up(Wq, 8) * _round_up(KC, 128) * comp_b
    w_blk = 4 * _round_up(KC, 8) * _round_up(C_out, 128) * comp_b
    out_blk = _round_up(C_out, 8) * _round_up(M_t, 128) * out_b
    interm = (2 * M_t * _round_up(KC, 128) * comp_b
              + 3 * M_t * _round_up(C_out, 128) * 4)
    vmem_est = 2 * (xs_blk + w_blk + out_blk) + interm
    vmem_limit = int(min(max(2 * vmem_est + (4 << 20), 16 << 20), 64 << 20))

    kernel = functools.partial(_stem_conv_kernel, tile_oh=tile_oh, wo_up=Wo_up)

    out_flat = pl.pallas_call(
        kernel,
        out_shape=jax.ShapeDtypeStruct((N, C_out, Ho * Wo_up), out_dtype),
        grid=grid,
        in_specs=[
            # whole image per batch index; block index constant over the row
            # band axis -> fetched once per image.
            pl.BlockSpec((None, Hq, Wq, KC), lambda n, t: (n, 0, 0, 0)),
            pl.BlockSpec((4, KC, C_out), lambda n, t: (0, 0, 0)),
            pl.BlockSpec((1, C_out), lambda n, t: (0, 0)),
        ],
        out_specs=pl.BlockSpec((None, C_out, M_t), lambda n, t: (n, 0, t)),
        compiler_params=pltpu.CompilerParams(
            dimension_semantics=("parallel", "arbitrary"),
            vmem_limit_bytes=vmem_limit,
        ),
        cost_estimate=cost,
    )(xs, w_all, b2d)

    out = out_flat.reshape(N, C_out, Ho, Wo_up)
    if Wo_up != Wo:                       # only for Wo % 8 != 0 (small inputs)
        out = out[:, :, :, :Wo]
    # norm_layer=None  =>  nn.Identity()  (no-op)
    return out


def _ref_conv(x, w, b):
    return lax.conv_general_dilated(
        x, w, window_strides=(STRIDE, STRIDE),
        padding=((PAD, PAD), (PAD, PAD)),
        dimension_numbers=("NCHW", "OIHW", "NCHW"),
    ) + b.reshape(1, -1, 1, 1)


if __name__ == "__main__":
    key = jax.random.PRNGKey(0)
    k_x, k_w, k_b, k_x2, k_w2, k_b2 = jax.random.split(key, 6)

    # ---- primary small config: batch=2, C_in=4, 16x16 spatial, C_out=32 ----
    N, C_in, H, W, C_out = 2, 4, 16, 16, 32
    fan_in = C_in * KH * KW
    bound = 1.0 / (fan_in ** 0.5)
    x = jax.random.normal(k_x, (N, C_in, H, W), dtype=jnp.float32)
    w = jax.random.uniform(k_w, (C_out, C_in, KH, KW), jnp.float32, -bound, bound)
    b = jax.random.uniform(k_b, (C_out,), jnp.float32, -bound, bound)

    Ho = (H + 2 * PAD - KH) // STRIDE + 1
    Wo = (W + 2 * PAD - KW) // STRIDE + 1

    # 1) bf16 streaming operands, f32 accumulation + f32 output
    fwd = jax.jit(functools.partial(stem_forward, compute_dtype=jnp.bfloat16,
                                    out_dtype=jnp.float32))
    out = jax.block_until_ready(fwd(x, w, b))
    assert out.shape == (N, C_out, Ho, Wo), out.shape
    # apples-to-apples reference: same bf16-rounded operands, f32 conv
    xq = x.astype(jnp.bfloat16).astype(jnp.float32)
    wq = w.astype(jnp.bfloat16).astype(jnp.float32)
    ref_q = _ref_conv(xq, wq, b)
    err = float(jnp.max(jnp.abs(out - ref_q)))
    assert err < 5e-3, err

    # 2) production path: bf16 output (halves writeback bytes)
    fwd_bf16 = jax.jit(functools.partial(stem_forward, compute_dtype=jnp.bfloat16,
                                         out_dtype=jnp.bfloat16))
    out_bf16 = jax.block_until_ready(fwd_bf16(x, w, b))
    assert out_bf16.dtype == jnp.bfloat16
    err_bf16 = float(jnp.max(jnp.abs(out_bf16.astype(jnp.float32) - ref_q)))
    assert err_bf16 < 2e-2, err_bf16

    # 3) multi row-band grid (2 bands/image) + f32 streaming path
    N2, C_in2, H2, W2, C_out2 = 2, 3, 64, 64, 64
    bound2 = 1.0 / ((C_in2 * KH * KW) ** 0.5)
    x2 = jax.random.normal(k_x2, (N2, C_in2, H2, W2), dtype=jnp.float32)
    w2 = jax.random.uniform(k_w2, (C_out2, C_in2, KH, KW), jnp.float32,
                            -bound2, bound2)
    b2 = jax.random.uniform(k_b2, (C_out2,), jnp.float32, -bound2, bound2)
    fwd2 = jax.jit(functools.partial(stem_forward, compute_dtype=jnp.float32,
                                     out_dtype=jnp.float32, tile_oh=8))
    out2 = jax.block_until_ready(fwd2(x2, w2, b2))
    ref2 = _ref_conv(x2, w2, b2)
    # tolerance covers the MXU's default (possibly reduced) f32 matmul precision
    err2 = float(jnp.max(jnp.abs(out2 - ref2)))
    assert out2.shape == ref2.shape and err2 < 2e-2, (out2.shape, err2)

    print("KERNEL_OK")
</pallas_src>

<mosaic_0001>
module attributes {stable_mosaic.version = 11 : i64} {
  func.func @_stem_conv_kernel(%arg0: i32, %arg1: i32, %arg2: memref<1x5x9x64xbf16, #tpu.memory_space<vmem>>, %arg3: memref<4x64x32xbf16, #tpu.memory_space<vmem>>, %arg4: memref<1x32xf32, #tpu.memory_space<vmem>>, %arg5: memref<1x32x32xf32, #tpu.memory_space<vmem>>) attributes {dimension_semantics = [#tpu.dimension_semantics<parallel>, #tpu.dimension_semantics<arbitrary>], iteration_bounds = array<i64: 2, 1>, scalar_prefetch = 0 : i64, scratch_operands = 0 : i64, tpu.core_type = #tpu.core_type<tc>, window_params = [{transform_indices = @transform_0, window_bounds = array<i64: 1, 5, 9, 64>}, {pipeline_mode = #tpu.pipeline_mode<synchronous>, transform_indices = @transform_1, window_bounds = array<i64: 4, 64, 32>}, {pipeline_mode = #tpu.pipeline_mode<synchronous>, transform_indices = @transform_2, window_bounds = array<i64: 1, 32>}, {transform_indices = @transform_3, window_bounds = array<i64: 1, 32, 32>}]} {
    %c4_i32 = arith.constant 4 : i32
    %0 = arith.muli %arg1, %c4_i32 : i32
    %c0_i32 = arith.constant 0 : i32
    %1 = arith.addi %0, %c0_i32 : i32
    %c0 = arith.constant 0 : index
    %2 = arith.index_cast %1 : i32 to index
    %c0_0 = arith.constant 0 : index
    %c0_1 = arith.constant 0 : index
    %3 = vector.load %arg2[%c0, %2, %c0_0, %c0_1] : memref<1x5x9x64xbf16, #tpu.memory_space<vmem>>, vector<1x4x8x64xbf16>
    %4 = vector.shape_cast %3 : vector<1x4x8x64xbf16> to vector<4x8x64xbf16>
    %5 = vector.shape_cast %4 : vector<4x8x64xbf16> to vector<32x64xbf16>
    %c0_2 = arith.constant 0 : index
    %c0_3 = arith.constant 0 : index
    %c0_4 = arith.constant 0 : index
    %6 = vector.load %arg3[%c0_2, %c0_3, %c0_4] : memref<4x64x32xbf16, #tpu.memory_space<vmem>>, vector<1x64x32xbf16>
    %7 = vector.shape_cast %6 : vector<1x64x32xbf16> to vector<64x32xbf16>
    %cst = arith.constant dense<0.000000e+00> : vector<32x32xf32>
    %8 = tpu.matmul %5, %7, %cst {dimension_numbers = #tpu.dot_dimension_numbers<[1], [0], [0], [1], [0, 0, 1, 1], [], []>} : vector<32x64xbf16>, vector<64x32xbf16>, vector<32x32xf32> -> vector<32x32xf32>
    %c0_i32_5 = arith.constant 0 : i32
    %9 = arith.addi %0, %c0_i32_5 : i32
    %c0_6 = arith.constant 0 : index
    %10 = arith.index_cast %9 : i32 to index
    %c1 = arith.constant 1 : index
    %c0_7 = arith.constant 0 : index
    %11 = vector.load %arg2[%c0_6, %10, %c1, %c0_7] : memref<1x5x9x64xbf16, #tpu.memory_space<vmem>>, vector<1x4x8x64xbf16>
    %12 = vector.shape_cast %11 : vector<1x4x8x64xbf16> to vector<4x8x64xbf16>
    %13 = vector.shape_cast %12 : vector<4x8x64xbf16> to vector<32x64xbf16>
    %c1_8 = arith.constant 1 : index
    %c0_9 = arith.constant 0 : index
    %c0_10 = arith.constant 0 : index
    %14 = vector.load %arg3[%c1_8, %c0_9, %c0_10] : memref<4x64x32xbf16, #tpu.memory_space<vmem>>, vector<1x64x32xbf16>
    %15 = vector.shape_cast %14 : vector<1x64x32xbf16> to vector<64x32xbf16>
    %cst_11 = arith.constant dense<0.000000e+00> : vector<32x32xf32>
    %16 = tpu.matmul %13, %15, %cst_11 {dimension_numbers = #tpu.dot_dimension_numbers<[1], [0], [0], [1], [0, 0, 1, 1], [], []>} : vector<32x64xbf16>, vector<64x32xbf16>, vector<32x32xf32> -> vector<32x32xf32>
    %17 = arith.addf %8, %16 : vector<32x32xf32>
    %c1_i32 = arith.constant 1 : i32
    %18 = arith.addi %0, %c1_i32 : i32
    %c0_12 = arith.constant 0 : index
    %19 = arith.index_cast %18 : i32 to index
    %c0_13 = arith.constant 0 : index
    %c0_14 = arith.constant 0 : index
    %20 = vector.load %arg2[%c0_12, %19, %c0_13, %c0_14] : memref<1x5x9x64xbf16, #tpu.memory_space<vmem>>, vector<1x4x8x64xbf16>
    %21 = vector.shape_cast %20 : vector<1x4x8x64xbf16> to vector<4x8x64xbf16>
    %22 = vector.shape_cast %21 : vector<4x8x64xbf16> to vector<32x64xbf16>
    %c2 = arith.constant 2 : index
    %c0_15 = arith.constant 0 : index
    %c0_16 = arith.constant 0 : index
    %23 = vector.load %arg3[%c2, %c0_15, %c0_16] : memref<4x64x32xbf16, #tpu.memory_space<vmem>>, vector<1x64x32xbf16>
    %24 = vector.shape_cast %23 : vector<1x64x32xbf16> to vector<64x32xbf16>
    %cst_17 = arith.constant dense<0.000000e+00> : vector<32x32xf32>
    %25 = tpu.matmul %22, %24, %cst_17 {dimension_numbers = #tpu.dot_dimension_numbers<[1], [0], [0], [1], [0, 0, 1, 1], [], []>} : vector<32x64xbf16>, vector<64x32xbf16>, vector<32x32xf32> -> vector<32x32xf32>
    %26 = arith.addf %17, %25 : vector<32x32xf32>
    %c1_i32_18 = arith.constant 1 : i32
    %27 = arith.addi %0, %c1_i32_18 : i32
    %c0_19 = arith.constant 0 : index
    %28 = arith.index_cast %27 : i32 to index
    %c1_20 = arith.constant 1 : index
    %c0_21 = arith.constant 0 : index
    %29 = vector.load %arg2[%c0_19, %28, %c1_20, %c0_21] : memref<1x5x9x64xbf16, #tpu.memory_space<vmem>>, vector<1x4x8x64xbf16>
    %30 = vector.shape_cast %29 : vector<1x4x8x64xbf16> to vector<4x8x64xbf16>
    %31 = vector.shape_cast %30 : vector<4x8x64xbf16> to vector<32x64xbf16>
    %c3 = arith.constant 3 : index
    %c0_22 = arith.constant 0 : index
    %c0_23 = arith.constant 0 : index
    %32 = vector.load %arg3[%c3, %c0_22, %c0_23] : memref<4x64x32xbf16, #tpu.memory_space<vmem>>, vector<1x64x32xbf16>
    %33 = vector.shape_cast %32 : vector<1x64x32xbf16> to vector<64x32xbf16>
    %cst_24 = arith.constant dense<0.000000e+00> : vector<32x32xf32>
    %34 = tpu.matmul %31, %33, %cst_24 {dimension_numbers = #tpu.dot_dimension_numbers<[1], [0], [0], [1], [0, 0, 1, 1], [], []>} : vector<32x64xbf16>, vector<64x32xbf16>, vector<32x32xf32> -> vector<32x32xf32>
    %35 = arith.addf %26, %34 : vector<32x32xf32>
    %c0_25 = arith.constant 0 : index
    %c0_26 = arith.constant 0 : index
    %36 = vector.load %arg4[%c0_25, %c0_26] : memref<1x32xf32, #tpu.memory_space<vmem>>, vector<1x32xf32>
    %37 = vector.broadcast %36 : vector<1x32xf32> to vector<32x32xf32>
    %38 = arith.addf %35, %37 : vector<32x32xf32>
    %39 = tpu.transpose %38, [1, 0] : vector<32x32xf32> -> vector<32x32xf32>
    %c0_27 = arith.constant 0 : index
    %c0_28 = arith.constant 0 : index
    %c0_29 = arith.constant 0 : index
    %40 = vector.load %arg5[%c0_27, %c0_28, %c0_29] : memref<1x32x32xf32, #tpu.memory_space<vmem>>, vector<1x32x32xf32>
    %41 = vector.shape_cast %40 : vector<1x32x32xf32> to vector<32x32xf32>
    %42 = vector.shape_cast %39 : vector<32x32xf32> to vector<1x32x32xf32>
    tpu.vector_store %arg5[%c0_27, %c0_28, %c0_29], %42 {strides = array<i32>} : memref<1x32x32xf32, #tpu.memory_space<vmem>>, vector<1x32x32xf32>,
    return
  }
  func.func @transform_0(%arg0: i32, %arg1: i32) -> (i32, i32, i32, i32) {
    %c0_i32 = arith.constant 0 : i32
    %c0_i32_0 = arith.constant 0 : i32
    %c0_i32_1 = arith.constant 0 : i32
    %c0_i32_2 = arith.constant 0 : i32
    return %arg0, %c0_i32, %c0_i32_0, %c0_i32_1 : i32, i32, i32, i32
  }
  func.func @transform_1(%arg0: i32, %arg1: i32) -> (i32, i32, i32) {
    %c0_i32 = arith.constant 0 : i32
    %c0_i32_0 = arith.constant 0 : i32
    %c0_i32_1 = arith.constant 0 : i32
    %c0_i32_2 = arith.constant 0 : i32
    return %c0_i32, %c0_i32_0, %c0_i32_1 : i32, i32, i32
  }
  func.func @transform_2(%arg0: i32, %arg1: i32) -> (i32, i32) {
    %c0_i32 = arith.constant 0 : i32
    %c0_i32_0 = arith.constant 0 : i32
    %c0_i32_1 = arith.constant 0 : i32
    return %c0_i32, %c0_i32_0 : i32, i32
  }
  func.func @transform_3(%arg0: i32, %arg1: i32) -> (i32, i32, i32) {
    %c0_i32 = arith.constant 0 : i32
    %c0_i32_0 = arith.constant 0 : i32
    return %arg0, %c0_i32, %arg1 : i32, i32, i32
  }
}

</mosaic_0001>

<bundles_post_ra>
// kernel: stem_forward.1
= control target key start
LH: loop header
LB: loop body
LE: loop exit
PB: predicated region body
PF: predicated region fallthrough
CT: control target
= control target key end

     0   :  { %s1112_s12 = smov 0   ;;  %s1114_s13 = smov 0   ;;  %s1274_s0 = inlined_call_operand.vmem [shape: bf16[2,5,9,64], index: 0, kind: input, shape index: {}]   ;;  %s1275_s1 = inlined_call_operand.vmem [shape: bf16[4,64,32], index: 1, kind: input, shape index: {}]   ;;  %s1276_s2 = inlined_call_operand.vmem [shape: f32[1,32], index: 2, kind: input, shape index: {}]   ;;  %s1277_s3 = inlined_call_operand.vmem [shape: f32[2,32,32], index: 3, kind: output, shape index: {}]  }
   0x1   :  { %s1116_s14 = smov 0  }
   0x2 LB: > { %s25_s15 = sadd.s32 1, %s1086_s13  ;;  %p862_p0 = scmp.ge.s32.totalorder %s1090_s14, 1  ;;  %s1090_s14 = sphi %s1116_s14, %s13_s14   ;;  %s1086_s13 = sphi %s1114_s13, %s1281_s13   ;;  %s1082_s12 = sphi %s1112_s12, %s1280_s12  }
   0x3   : > { %p27_p1 = scmp.ge.s32.totalorder %s25_s15, 2  ;;  %p151_p2 = scmp.lt.s32.totalorder %s1090_s14, 3 }
   0x5   : > { %s1283_s15 = smov (%p27_p1, %s25_s15), 0  ;;  %p152_p3 = pnand %p862_p0, %p151_p2 }
   0x6   : > { %v1048_v0 = vld [vmem:[%s1275_s1 + $0x20] sm:$0xff] (!%p152_p3)   ;;  %p178_p4 = scmp.lt.s32.totalorder (!%p152_p3), %s1082_s12, 1  ;;  %v1050_v2 = vld [vmem:[%s1275_s1 + $0x28] sm:$0xff] (!%p152_p3)   ;;  %v1052_v4 = vld [vmem:[%s1275_s1 + $0x30] sm:$0xff] (!%p152_p3)   ;;  %vm310_vm0 = vcmask (!%p152_p3), 523264   ;;  %vm770_vm4 = vcmask (!%p152_p3), 261120  }
   0x7   : > { %155 = sbr.rel (%p152_p3) target bundleno = 410 (0x19a), region = 32  ;;  %v1049_v1 = vld [vmem:[%s1275_s1 + $0x40] sm:$0xff] (!%p152_p3)   ;;  %962 = vmatprep.subr.bf16.mxu1 (!%p152_p3), %v1048_v0  ;;  %v1051_v3 = vld [vmem:[%s1275_s1 + $0x48] sm:$0xff] (!%p152_p3)   ;;  %v1053_v5 = vld [vmem:[%s1275_s1 + $0x50] sm:$0xff] (!%p152_p3)   ;;  %vm212_vm1 = vsmask.f32 (!%p152_p3), 3328 }
   0x8   : > { %986 = vmatprep.subr.bf16.mxu0 (!%p152_p3), %v1049_v1  ;;  %963 = vmatpush3.bf16.msra.mxu1 (!%p152_p3), %v1048_v0  ;;  %v1054_v6 = vld [vmem:[%s1275_s1 + $0x38] sm:$0xff] (!%p152_p3)   ;;  %vm213_vm2 = vsmask.f32 (!%p152_p3), 7440  ;;  %v1177_v18 = vld [vmem:[%s1275_s1] sm:$0xff] (!%p152_p3)   ;;  %v1061_v50 = vld [vmem:[%s1275_s1 + $0x68] sm:$0xff] (!%p152_p3)  }
   0x9   : > { %987 = vmatpush3.bf16.msra.mxu0 (!%p152_p3), %v1049_v1  ;;  %964 = vmatprep.subr.bf16.mxu1 (!%p152_p3), %v1050_v2  ;;  %v1055_v7 = vld [vmem:[%s1275_s1 + $0x58] sm:$0xff] (!%p152_p3)   ;;  %v1058_v19 = vld [vmem:[%s1275_s1 + $0x60] sm:$0xff] (!%p152_p3)   ;;  %vm1184_vm3 = vmor (!%p152_p3), %vm212_vm1, %vm213_vm2 }
   0xa   : > { %988 = vmatprep.subr.bf16.mxu0 (!%p152_p3), %v1051_v3  ;;  %v1063_v56 = vld [vmem:[%s1275_s1 + $0x70] sm:$0xff] (!%p152_p3)   ;;  %v1060_v59 = vld [vmem:[%s1275_s1 + $0x8] sm:$0xff] (!%p152_p3)   ;;  %v1065_v1 = vld [vmem:[%s1275_s1 + $0x78] sm:$0xff] (!%p152_p3)  }
   0xb   : > { %v934_v24 = vld [vmem:[%s1276_s2] ss:$0 sm:$0xff] (!%p152_p3) }
   0xc   : > { %965 = vmatpush3.bf16.msra.mxu1 (!%p152_p3), %v1050_v2 }
   0xd   : > { %989 = vmatpush3.bf16.msra.mxu0 (!%p152_p3), %v1051_v3  ;;  %966 = vmatprep.subr.bf16.mxu1 (!%p152_p3), %v1052_v4 }
   0xe   : > { %s1285_s12 = smov (!%p178_p4, %s1082_s12), 1  ;;  %990 = vmatprep.subr.bf16.mxu0 %v1053_v5 }
   0xf   : > { %s1022_s26 = smul.u32 40, %s1285_s12  ;;  %s937_s4 = sshll.u32 %s1285_s12, 5 }
  0x10   : > { %967 = vmatpush3.bf16.msra.mxu1 %v1052_v4  ;;  %s190_s7 = scalar_lea.vmem %s1277_s3, %s937_s4 }
  0x11   : > { %s1157_s6 = scalar_lea.vmem %s1274_s0, %s1022_s26  ;;  %991 = vmatpush3.bf16.msra.mxu0 %v1053_v5  ;;  %968 = vmatprep.subr.bf16.mxu1 %v1054_v6 }
  0x12   : > { %v1163_v8 = vld [vmem:[%s1157_s6] sm:$0xf]  ;;  %v1166_v9 = vld [vmem:[%s1157_s6 + $0x8] sm:$0xf]  ;;  %v208_v10 = vld [vmem:[%s1157_s6 + $0x4] sm:$0x1]  ;;  %992 = vmatprep.subr.bf16.mxu0 %v1055_v7 }
  0x13   : > { %v209_v11 = vld [vmem:[%s1157_s6 + $0xc] sm:$0x1]  ;;  %v216_v12 = vshrl.u32 %v1163_v8, 16  ;;  %v219_v13 = vshll.u32 %v1163_v8, 16  ;;  %v225_v14 = vshll.u32 %v208_v10, 16  ;;  %v230_v15 = vshrl.u32 %v1166_v9, 16 }
  0x14   : > { %v233_v16 = vshll.u32 %v1166_v9, 16  ;;  %v239_v17 = vshll.u32 %v209_v11, 16  ;;  %v1057_v27 = vld [vmem:[%s1157_s6 + $0x8] ss:$8 sps:$4 sm:$0xff]   ;;  %969 = vmatpush3.bf16.msra.mxu1 %v1054_v6  ;;  %v1194_v31 = vld [vmem:[%s1157_s6 + $0x18] sm:$0xf]  ;;  %v882_v6 = vcombine.low %v1163_v8, %v1166_v9 }
  0x15   : > { %v218_v20 = vrot.slane %v216_v12, 4  ;;  %v221_v21 = vrot.slane %v219_v13, 5  ;;  %v227_v22 = vrot.slane %v225_v14, 5  ;;  %v232_v23 = vrot.slane %v230_v15, 4  ;;  %v1190_v29 = vld [vmem:[%s1157_s6 + $0x10] sm:$0xf]  ;;  %994 = vmatprep.mubr.msk.bf16.mxu0 %vm310_vm0, %v1057_v27  ;;  %993 = vmatpush3.bf16.msra.mxu0 %v1055_v7 }
  0x16   : > { %v235_v25 = vrot.slane %v233_v16, 5  ;;  %v241_v26 = vrot.slane %v239_v17, 5  ;;  %v210_v32 = vld [vmem:[%s1157_s6 + $0x14] sm:$0x1]  ;;  %v211_v33 = vld [vmem:[%s1157_s6 + $0x1c] sm:$0x1]  ;;  %974 = vmatprep.subr.bf16.mxu1 %v1177_v18  ;;  %998 = vmatprep.subr.bf16.mxu0 %v1058_v19 }
  0x17   : > { %v222_v28 = vor.u32 %v221_v21, %v218_v20  ;;  %v244_v35 = vshrl.u32 %v1190_v29, 16  ;;  %v247_v36 = vshll.u32 %v1190_v29, 16  ;;  %v253_v37 = vshll.u32 %v210_v32, 16  ;;  %v1059_v45 = vld [vmem:[%s1157_s6 + $0x18] ss:$8 sps:$4 sm:$0xff]  }
  0x18   : > { %v236_v30 = vor.u32 %v235_v25, %v232_v23  ;;  %v258_v39 = vshrl.u32 %v1194_v31, 16  ;;  %v261_v40 = vshll.u32 %v1194_v31, 16  ;;  %v267_v41 = vshll.u32 %v211_v33, 16  ;;  %995 = vmatmul.mubr.msk.bf16.vlgmr.msra.gmra.mrb[0].mxu0 %vm310_vm0, %v1059_v45  ;;  %v910_v61 = vld [vmem:[%s1157_s6 + $0x8] sm:$0xf] }
  0x19   : > { %v223_v34 = vrot.slane %v222_v28, 4  ;;  %v246_v43 = vrot.slane %v244_v35, 4  ;;  %v249_v44 = vrot.slane %v247_v36, 5  ;;  %v255_v47 = vrot.slane %v253_v37, 5  ;;  %999 = vmatpush3.bf16.msra.mxu0 %v1058_v19  ;;  %v911_v62 = vld [vmem:[%s1157_s6 + $0xc] sm:$0x1] }
  0x1a   : > { %v237_v38 = vrot.slane %v236_v30, 4  ;;  %v260_v48 = vrot.slane %v258_v39, 4  ;;  %v263_v49 = vrot.slane %v261_v40, 5  ;;  %v269_v54 = vrot.slane %v267_v41, 5  ;;  %1000 = vmatprep.subr.bf16.mxu0 %v1061_v50  ;;  %v912_v63 = vld [vmem:[%s1157_s6 + $0x10] sm:$0xf] }
  0x1b   : > { %v228_v42 = vsel %vm1184_vm3, %v223_v34, %v227_v22  ;;  %v250_v52 = vor.u32 %v249_v44, %v246_v43  ;;  %v913_v2 = vld [vmem:[%s1157_s6 + $0x14] sm:$0x1]  ;;  %v574_v3 = vshrl.u32 %v910_v61, 16  ;;  %v577_v4 = vshll.u32 %v910_v61, 16  ;;  %v914_v12 = vld [vmem:[%s1157_s6 + $0x18] sm:$0xf] }
  0x1c   : > { %v242_v46 = vsel %vm1184_vm3, %v237_v38, %v241_v26  ;;  %v264_v53 = vor.u32 %v263_v49, %v260_v48  ;;  %v583_v5 = vshll.u32 %v911_v62, 16  ;;  %v588_v7 = vshrl.u32 %v912_v63, 16  ;;  %v915_v16 = vld [vmem:[%s1157_s6 + $0x1c] sm:$0x1]  ;;  %v916_v8 = vld [vmem:[%s1157_s6 + $0x20] sm:$0xf] }
  0x1d   : > { %v874_v51 = vcombine.low %v228_v42, %v242_v46  ;;  %v251_v55 = vrot.slane %v250_v52, 4  ;;  %1001 = vmatpush3.bf16.msra.mxu0 %v1061_v50  ;;  %v591_v10 = vshll.u32 %v912_v63, 16  ;;  %v597_v11 = vshll.u32 %v913_v2, 16  ;;  %v1062_v22 = vld [vmem:[%s1275_s1 + $0x10] sm:$0xff]   ;;  %v917_v25 = vld [vmem:[%s1157_s6 + $0x24] sm:$0x1] }
  0x1e   : > { %v265_v57 = vrot.slane %v264_v53, 4  ;;  %1002 = vmatprep.subr.bf16.mxu0 %v1063_v56  ;;  %v576_v13 = vrot.slane %v574_v3, 4  ;;  %v579_v14 = vrot.slane %v577_v4, 5  ;;  %v585_v15 = vrot.slane %v583_v5, 5  ;;  %v1064_v40 = vld [vmem:[%s1275_s1 + $0x18] sm:$0xff]  }
  0x1f   : > { %970 = vmatprep.mubr.msk.bf16.mxu1 %vm310_vm0, %v874_v51  ;;  %v256_v58 = vsel %vm1184_vm3, %v251_v55, %v255_v47  ;;  %v602_v17 = vshrl.u32 %v914_v12, 16  ;;  %v590_v19 = vrot.slane %v588_v7, 4  ;;  %v593_v20 = vrot.slane %v591_v10, 5 }
  0x20   : > { %v270_v60 = vsel %vm1184_vm3, %v265_v57, %v269_v54  ;;  %v599_v21 = vrot.slane %v597_v11, 5  ;;  %v605_v9 = vshll.u32 %v914_v12, 16  ;;  %v580_v23 = vor.u32 %v579_v14, %v576_v13 }
  0x21   : > { %v875_v0 = vcombine.low %v256_v58, %v270_v60  ;;  %1003 = vmatpush3.bf16.msra.mxu0 %v1063_v56  ;;  %v604_v26 = vrot.slane %v602_v17, 4  ;;  %v611_v27 = vshll.u32 %v915_v16, 16  ;;  %v616_v28 = vshrl.u32 %v916_v8, 16 }
  0x22   : > { %1004 = vmatprep.subr.bf16.mxu0 %v1065_v1  ;;  %v607_v30 = vrot.slane %v605_v9, 5  ;;  %v619_v32 = vshll.u32 %v916_v8, 16  ;;  %v625_v33 = vshll.u32 %v917_v25, 16  ;;  %v581_v34 = vrot.slane %v580_v23, 4 }
  0x23   : > { %971 = vmatmul.mubr.msk.bf16.vlgmr.msra.gmra.mrb[0].mxu1 %vm310_vm0, %v875_v0  ;;  %v618_v35 = vrot.slane %v616_v28, 4  ;;  %v613_v38 = vrot.slane %v611_v27, 5  ;;  %v883_v50 = vcombine.low %v1190_v29, %v1194_v31 }
  0x24   : > { %975 = vmatpush3.bf16.msra.mxu1 %v1177_v18  ;;  %982 = vmatprep.mubr.msk.bf16.mxu1 %vm310_vm0, %v882_v6  ;;  %v594_v18 = vor.u32 %v593_v20, %v590_v19  ;;  %v608_v37 = vor.u32 %v607_v30, %v604_v26  ;;  %v621_v39 = vrot.slane %v619_v32, 5  ;;  %v586_v41 = vsel %vm1184_vm3, %v581_v34, %v585_v15 }
  0x25   : > { %976 = vmatprep.subr.bf16.mxu1 %v1060_v59  ;;  %1005 = vmatpush3.bf16.msra.mxu0 %v1065_v1  ;;  %v627_v45 = vrot.slane %v625_v33, 5 }
  0x26   : > { %v595_v36 = vrot.slane %v594_v18, 4  ;;  %v609_v43 = vrot.slane %v608_v37, 4  ;;  %v622_v44 = vor.u32 %v621_v39, %v618_v35 }
  0x28   : > { %977 = vmatpush3.bf16.msra.mxu1 %v1060_v59  ;;  %v600_v42 = vsel %vm1184_vm3, %v595_v36, %v599_v21  ;;  %v614_v47 = vsel %vm1184_vm3, %v609_v43, %v613_v38  ;;  %v623_v48 = vrot.slane %v622_v44, 4 }
  0x29   : > { %978 = vmatprep.subr.bf16.mxu1 %v1062_v22  ;;  %v926_v46 = vcombine.low %v586_v41, %v600_v42 }
  0x2a   : > { %v628_v49 = vsel %vm1184_vm3, %v623_v48, %v627_v45 }
  0x2b   : > { %1006 = vmatprep.mubr.msk.bf16.mxu0 %vm310_vm0, %v926_v46  ;;  %v927_v51 = vcombine.low %v614_v47, %v628_v49 }
  0x2c   : > { %979 = vmatpush3.bf16.msra.mxu1 %v1062_v22 }
  0x2d   : > { %980 = vmatprep.subr.bf16.mxu1 %v1064_v40  ;;  %1007 = vmatmul.mubr.msk.bf16.vlgmr.msra.gmra.mrb[0].mxu0 %vm310_vm0, %v927_v51 }
  0x30   : > { %981 = vmatpush3.bf16.msra.mxu1 %v1064_v40 }
  0x33   : > { %983 = vmatmul.mubr.msk.bf16.vlgmr.msra.gmra.mrb[0].mxu1 %vm310_vm0, %v883_v50 }
 0x100   : > { %v1008_v52 = vpop.f32.mrb[0].mxu0 }
 0x101   : > { %v708_v53 = vpop.f32.mrb[1].mxu0 }
 0x102   : > { %v1009_v55 = vpop.f32.mrb[2].mxu0 }
 0x103   : > { %v711_v58 = vpop.f32.mrb[3].mxu0 }
 0x106   : > { %v984_v54 = vpop.f32.mrb[0].mxu1 }
 0x107   : > { %v1010_v56 = vadd.f32 %v1008_v52, %v984_v54  ;;  %v440_v57 = vpop.f32.mrb[1].mxu1 }
 0x108   : > { %v1011_v59 = vadd.f32 %v708_v53, %v440_v57  ;;  %v985_v29 = vpop.f32.mrb[2].mxu1 }
 0x109   : > { %v1012_v31 = vadd.f32 %v1009_v55, %v985_v29  ;;  %v443_v60 = vpop.f32.mrb[3].mxu1  ;;  %v736_v0 = vadd.f32 %v1010_v56, %v934_v24 }
 0x10a   : > { %v1013_v61 = vadd.f32 %v711_v58, %v443_v60  ;;  %v734_v62 = vadd.f32 %v1011_v59, %v934_v24 }
 0x10b   : > { %v737_v1 = vadd.f32 %v1012_v31, %v934_v24 }
 0x10c   : > { %738 = vxpose.xlu0.b32.start [1/4] (short) (narrow) %v734_v62, 32  ;;  %v735_v63 = vadd.f32 %v1013_v61, %v934_v24 }
 0x110   : > { %739 = vxpose.xlu0.b32.cont [2/4] (short) (narrow) %v735_v63, 32 }
 0x114   : > { %740 = vxpose.xlu0.b32.cont [3/4] (short) (narrow) %v736_v0, 32 }
 0x118   : > { %741 = vxpose.xlu0.b32.end [4/4] (short) (narrow) %v737_v1, 32 }
 0x18c   : > { %v754_v2 = vpop.trf.xlu0 }
 0x18d   : > { %771 = vst.msk [vmem:[%s190_s7] sm:$0xff] %vm770_vm4, %v754_v2 }
 0x190   : > { %v755_v3 = vpop.trf.xlu0 }
 0x191   : > { %772 = vst.msk [vmem:[%s190_s7 + $0x8] sm:$0xff] %vm770_vm4, %v755_v3 }
 0x194   : > { %v756_v4 = vpop.trf.xlu0 }
 0x195   : > { %773 = vst.msk [vmem:[%s190_s7 + $0x10] sm:$0xff] %vm770_vm4, %v756_v4 }
 0x198   : > { %v757_v5 = vpop.trf.xlu0 }
 0x199   : > { %774 = vst.msk [vmem:[%s190_s7 + $0x18] sm:$0xff] %vm770_vm4, %v757_v5 }
 0x19a PF: > { %s13_s14 = sadd.s32 1, %s1090_s14   ;;  %s1280_s12 = smov %s1086_s13 }
 0x19b   : > { %p10_p5 = scmp.ge.s32.totalorder %s13_s14, 4   ;;  %s1281_s13 = smov %s1283_s15 }
 0x19d   :  { %12 = sbr.rel (!%p10_p5) target bundleno = 2 (0x2), region = 67 }

</bundles_post_ra>
